<compile_context>
chip_gen: v7x
topology: tpu7x:2x2x1
jax: 0.10.0
libtpu: 0.0.40
codegen_flags: <defaults>
</compile_context>

<pallas_src>
import functools

import jax
import jax.numpy as jnp
from jax.experimental import pallas as pl
from jax.experimental.pallas import tpu as pltpu

_LANES = 128


def _make_mixup_kernel(tb, num_classes):
    """Fused image-mixup (with 1-image carry) + target one-hot mixup kernel."""

    def kernel(scal_ref, x_ref, t_ref, tr_ref, o_img_ref, o_tgt_ref, carry_ref):
        j = pl.program_id(0)
        last = pl.num_programs(0) - 1
        lam = scal_ref[0]   # f32
        oml = scal_ref[1]   # f32 (1 - lam); exactly 0.0 when mixup is not applied

        # ---- image blend: block j-1 of the batch, rolled neighbour via carry ----
        @pl.when(j > 0)
        def _():
            x = x_ref[...].astype(jnp.float32)            # (tb, T, 128)
            prev0 = carry_ref[...].astype(jnp.float32)    # (1, T, 128) = last image
                                                          # of the previous block
            keep = oml == 0.0                             # "not applied" guard
            b0 = lam * x[0:1] + oml * prev0
            o_img_ref[0:1] = jnp.where(keep, x[0:1], b0).astype(o_img_ref.dtype)
            if tb > 1:  # static Python
                b1 = lam * x[1:] + oml * x[:-1]
                o_img_ref[1:] = jnp.where(keep, x[1:], b1).astype(o_img_ref.dtype)

        # Carry <- last image of the block fetched this step (used next step).
        carry_ref[...] = x_ref[tb - 1:tb, :, :]

        # ---- fused target one-hot + mix, emitted once on the final step ----
        @pl.when(j == last)
        def _():
            classes = jax.lax.broadcasted_iota(jnp.int32, o_tgt_ref.shape, 1)
            oh = (classes == t_ref[...]).astype(jnp.float32)
            ohr = (classes == tr_ref[...]).astype(jnp.float32)
            mixed = jnp.where(oml == 0.0, oh, lam * oh + oml * ohr)
            o_tgt_ref[...] = mixed.astype(o_tgt_ref.dtype)

    return kernel


def random_mixup(batch, target, key, *, num_classes, p=0.5, alpha=1.0):
    """Pallas implementation of RandomMixup.forward.

    batch:  (B, C, H, W) float
    target: (B,) integer class ids
    key:    PRNG key driving the (apply?, lambda) randomness
    """
    B, C, H, W = batch.shape
    out_dtype = batch.dtype

    # ---- randomness (matches the PyTorch module: apply iff rand < p) ----
    k_apply, k_lam = jax.random.split(key)
    apply = jax.random.uniform(k_apply) < p
    # Dirichlet([alpha, alpha])[0] == Beta(alpha, alpha)
    lam_beta = jax.random.beta(k_lam, alpha, alpha).astype(jnp.float32)
    lam = jnp.where(apply, lam_beta, jnp.float32(1.0))
    oml = jnp.where(apply, jnp.float32(1.0) - lam_beta, jnp.float32(0.0))
    scal = jnp.stack([lam, oml])          # (2,) f32 -> SMEM

    # ---- lane-dense re-layout: (B, C, H, W) -> (B, T, 128) (pure view + pad) ----
    chw = C * H * W
    T = pl.cdiv(chw, _LANES)
    pad = T * _LANES - chw
    x = batch.reshape(B, chw)
    if pad:
        x = jnp.pad(x, ((0, 0), (0, pad)))
    x = x.reshape(B, T, _LANES)

    # ---- images per grid step: ~<=2 MiB per block, must divide B (carry logic) --
    bytes_per_image = T * _LANES * x.dtype.itemsize
    budget = 2 * 1024 * 1024
    tb = max(1, min(B, budget // max(1, bytes_per_image)))
    while B % tb:
        tb -= 1
    nb = B // tb

    # TODO(synk): PyTorch requires int64 targets; JAX default is int32 here
    # (class-id semantics identical).
    target_i32 = target.astype(jnp.int32).reshape(B, 1)
    target_rolled = jnp.roll(target_i32, 1, axis=0)   # tiny index glue

    kernel = _make_mixup_kernel(tb, num_classes)

    mixed_x, mixed_target = pl.pallas_call(
        kernel,
        out_shape=(
            jax.ShapeDtypeStruct((B, T, _LANES), out_dtype),
            jax.ShapeDtypeStruct((B, num_classes), out_dtype),
        ),
        grid=(nb + 1,),
        in_specs=[
            pl.BlockSpec(memory_space=pltpu.MemorySpace.SMEM),       # [lam, 1-lam]
            # step 0 reads the LAST block (primes carry with image B-1),
            # step j>=1 reads block j-1.
            pl.BlockSpec((tb, T, _LANES), lambda j: ((j + nb - 1) % nb, 0, 0)),
            pl.BlockSpec((B, 1), lambda j: (0, 0)),                  # target (resident)
            pl.BlockSpec((B, 1), lambda j: (0, 0)),                  # rolled target
        ],
        out_specs=(
            # step 0 shares block 0 with step 1 (kept resident, no garbage writeback);
            # step j>=1 writes block j-1.
            pl.BlockSpec((tb, T, _LANES), lambda j: (jnp.maximum(j - 1, 0), 0, 0)),
            pl.BlockSpec((B, num_classes), lambda j: (0, 0)),        # resident, last step
        ),
        scratch_shapes=[pltpu.VMEM((1, T, _LANES), x.dtype)],        # 1-image carry
        compiler_params=pltpu.CompilerParams(
            dimension_semantics=("arbitrary",)),                     # carry => sequential
    )(scal, x, target_i32, target_rolled)

    mixed_x = mixed_x.reshape(B, T * _LANES)
    if pad:
        mixed_x = mixed_x[:, :chw]
    mixed_batch = mixed_x.reshape(B, C, H, W)
    return mixed_batch, mixed_target


if __name__ == "__main__":
    num_classes = 10
    p = 0.5
    alpha = 1.0

    root = jax.random.PRNGKey(0)
    k_data, k_tgt, k_mix = jax.random.split(root, 3)

    B, C, H, W = 2, 4, 16, 16
    batch = jax.random.normal(k_data, (B, C, H, W), dtype=jnp.float32)
    target = jax.random.randint(k_tgt, (B,), 0, num_classes, dtype=jnp.int32)

    fn = jax.jit(functools.partial(
        random_mixup, num_classes=num_classes, p=p, alpha=alpha))
    mixed_batch, mixed_target = fn(batch, target, k_mix)
    jax.block_until_ready((mixed_batch, mixed_target))

    # Pure-JAX reference with identical randomness.
    k_apply, k_lam = jax.random.split(k_mix)
    apply = jax.random.uniform(k_apply) < p
    lam = jnp.where(apply, jax.random.beta(k_lam, alpha, alpha),
                    1.0).astype(jnp.float32)
    ref_batch = lam * batch + (1.0 - lam) * jnp.roll(batch, 1, axis=0)
    oh = jax.nn.one_hot(target, num_classes, dtype=batch.dtype)
    ref_target = lam * oh + (1.0 - lam) * jnp.roll(oh, 1, axis=0)

    assert mixed_batch.shape == (B, C, H, W) and mixed_batch.dtype == jnp.float32
    assert mixed_target.shape == (B, num_classes) and mixed_target.dtype == jnp.float32
    assert jnp.allclose(mixed_batch, ref_batch, atol=1e-5, rtol=1e-5)
    assert jnp.allclose(mixed_target, ref_target, atol=1e-5, rtol=1e-5)

    print("KERNEL_OK")
</pallas_src>

<mosaic_0001>
module attributes {stable_mosaic.version = 11 : i64} {
  func.func @kernel(%arg0: i32, %arg1: memref<2xf32, #tpu.memory_space<smem>>, %arg2: memref<2x8x128xf32, #tpu.memory_space<vmem>>, %arg3: memref<2x1xi32, #tpu.memory_space<vmem>>, %arg4: memref<2x1xi32, #tpu.memory_space<vmem>>, %arg5: memref<2x8x128xf32, #tpu.memory_space<vmem>>, %arg6: memref<2x10xf32, #tpu.memory_space<vmem>>, %arg7: memref<1x8x128xf32, #tpu.memory_space<vmem>>) attributes {dimension_semantics = [#tpu.dimension_semantics<arbitrary>], iteration_bounds = array<i64: 2>, scalar_prefetch = 0 : i64, scratch_operands = 1 : i64, tpu.core_type = #tpu.core_type<tc>, window_params = [{transform_indices = @transform_0, window_bounds = array<i64: 2>}, {transform_indices = @transform_1, window_bounds = array<i64: 2, 8, 128>}, {pipeline_mode = #tpu.pipeline_mode<synchronous>, transform_indices = @transform_2, window_bounds = array<i64: 2, 1>}, {pipeline_mode = #tpu.pipeline_mode<synchronous>, transform_indices = @transform_3, window_bounds = array<i64: 2, 1>}, {transform_indices = @transform_4, window_bounds = array<i64: 2, 8, 128>}, {pipeline_mode = #tpu.pipeline_mode<synchronous>, transform_indices = @transform_5, window_bounds = array<i64: 2, 10>}]} {
    %c0 = arith.constant 0 : index
    %0 = memref.load %arg1[%c0] : memref<2xf32, #tpu.memory_space<smem>>
    %c1 = arith.constant 1 : index
    %1 = memref.load %arg1[%c1] : memref<2xf32, #tpu.memory_space<smem>>
    %c0_i32 = arith.constant 0 : i32
    %2 = arith.cmpi sgt, %arg0, %c0_i32 : i32
    %3 = arith.extui %2 : i1 to i32
    %c0_i32_0 = arith.constant 0 : i32
    %4 = arith.cmpi ne, %3, %c0_i32_0 : i32
    scf.if %4 {
      %c0_8 = arith.constant 0 : index
      %c0_9 = arith.constant 0 : index
      %c0_10 = arith.constant 0 : index
      %10 = vector.load %arg2[%c0_8, %c0_9, %c0_10] : memref<2x8x128xf32, #tpu.memory_space<vmem>>, vector<2x8x128xf32>
      %c0_11 = arith.constant 0 : index
      %c0_12 = arith.constant 0 : index
      %c0_13 = arith.constant 0 : index
      %11 = vector.load %arg7[%c0_11, %c0_12, %c0_13] : memref<1x8x128xf32, #tpu.memory_space<vmem>>, vector<1x8x128xf32>
      %cst = arith.constant 0.000000e+00 : f32
      %12 = arith.cmpf oeq, %1, %cst : f32
      %13 = vector.extract_strided_slice %10 {offsets = [0, 0, 0], sizes = [1, 8, 128], strides = [1, 1, 1]} : vector<2x8x128xf32> to vector<1x8x128xf32>
      %14 = vector.broadcast %0 : f32 to vector<1x8x128xf32>
      %15 = arith.mulf %14, %13 : vector<1x8x128xf32>
      %16 = vector.broadcast %1 : f32 to vector<1x8x128xf32>
      %17 = arith.mulf %16, %11 : vector<1x8x128xf32>
      %18 = arith.addf %15, %17 : vector<1x8x128xf32>
      %19 = vector.extract_strided_slice %10 {offsets = [0, 0, 0], sizes = [1, 8, 128], strides = [1, 1, 1]} : vector<2x8x128xf32> to vector<1x8x128xf32>
      %20 = arith.select %12, %19, %18 : vector<1x8x128xf32>
      %c0_14 = arith.constant 0 : index
      %c0_15 = arith.constant 0 : index
      %c0_16 = arith.constant 0 : index
      %21 = vector.load %arg5[%c0_14, %c0_15, %c0_16] : memref<2x8x128xf32, #tpu.memory_space<vmem>>, vector<1x8x128xf32>
      tpu.vector_store %arg5[%c0_14, %c0_15, %c0_16], %20 {strides = array<i32>} : memref<2x8x128xf32, #tpu.memory_space<vmem>>, vector<1x8x128xf32>,
      %22 = vector.extract_strided_slice %10 {offsets = [1, 0, 0], sizes = [1, 8, 128], strides = [1, 1, 1]} : vector<2x8x128xf32> to vector<1x8x128xf32>
      %23 = vector.broadcast %0 : f32 to vector<1x8x128xf32>
      %24 = arith.mulf %23, %22 : vector<1x8x128xf32>
      %25 = vector.extract_strided_slice %10 {offsets = [0, 0, 0], sizes = [1, 8, 128], strides = [1, 1, 1]} : vector<2x8x128xf32> to vector<1x8x128xf32>
      %26 = vector.broadcast %1 : f32 to vector<1x8x128xf32>
      %27 = arith.mulf %26, %25 : vector<1x8x128xf32>
      %28 = arith.addf %24, %27 : vector<1x8x128xf32>
      %29 = vector.extract_strided_slice %10 {offsets = [1, 0, 0], sizes = [1, 8, 128], strides = [1, 1, 1]} : vector<2x8x128xf32> to vector<1x8x128xf32>
      %30 = arith.select %12, %29, %28 : vector<1x8x128xf32>
      %c1_17 = arith.constant 1 : index
      %c0_18 = arith.constant 0 : index
      %c0_19 = arith.constant 0 : index
      %31 = vector.load %arg5[%c1_17, %c0_18, %c0_19] : memref<2x8x128xf32, #tpu.memory_space<vmem>>, vector<1x8x128xf32>
      tpu.vector_store %arg5[%c1_17, %c0_18, %c0_19], %30 {strides = array<i32>} : memref<2x8x128xf32, #tpu.memory_space<vmem>>, vector<1x8x128xf32>,
    } else {
    }
    %c1_1 = arith.constant 1 : index
    %c0_2 = arith.constant 0 : index
    %c0_3 = arith.constant 0 : index
    %5 = vector.load %arg2[%c1_1, %c0_2, %c0_3] : memref<2x8x128xf32, #tpu.memory_space<vmem>>, vector<1x8x128xf32>
    %c0_4 = arith.constant 0 : index
    %c0_5 = arith.constant 0 : index
    %c0_6 = arith.constant 0 : index
    %6 = vector.load %arg7[%c0_4, %c0_5, %c0_6] : memref<1x8x128xf32, #tpu.memory_space<vmem>>, vector<1x8x128xf32>
    tpu.vector_store %arg7[%c0_4, %c0_5, %c0_6], %5 {strides = array<i32>} : memref<1x8x128xf32, #tpu.memory_space<vmem>>, vector<1x8x128xf32>,
    %c1_i32 = arith.constant 1 : i32
    %7 = arith.cmpi eq, %arg0, %c1_i32 : i32
    %8 = arith.extui %7 : i1 to i32
    %c0_i32_7 = arith.constant 0 : i32
    %9 = arith.cmpi ne, %8, %c0_i32_7 : i32
    scf.if %9 {
      %10 = tpu.iota {dimensions = array<i32: 1>} : vector<2x10xi32>
      %c0_8 = arith.constant 0 : index
      %c0_9 = arith.constant 0 : index
      %11 = vector.load %arg3[%c0_8, %c0_9] : memref<2x1xi32, #tpu.memory_space<vmem>>, vector<2x1xi32>
      %12 = vector.broadcast %11 : vector<2x1xi32> to vector<2x10xi32>
      %13 = arith.cmpi eq, %10, %12 : vector<2x10xi32>
      %14 = arith.extui %13 : vector<2x10xi1> to vector<2x10xi32>
      %15 = arith.sitofp %14 : vector<2x10xi32> to vector<2x10xf32>
      %c0_10 = arith.constant 0 : index
      %c0_11 = arith.constant 0 : index
      %16 = vector.load %arg4[%c0_10, %c0_11] : memref<2x1xi32, #tpu.memory_space<vmem>>, vector<2x1xi32>
      %17 = vector.broadcast %16 : vector<2x1xi32> to vector<2x10xi32>
      %18 = arith.cmpi eq, %10, %17 : vector<2x10xi32>
      %19 = arith.extui %18 : vector<2x10xi1> to vector<2x10xi32>
      %20 = arith.sitofp %19 : vector<2x10xi32> to vector<2x10xf32>
      %cst = arith.constant 0.000000e+00 : f32
      %21 = arith.cmpf oeq, %1, %cst : f32
      %22 = vector.broadcast %0 : f32 to vector<2x10xf32>
      %23 = arith.mulf %22, %15 : vector<2x10xf32>
      %24 = vector.broadcast %1 : f32 to vector<2x10xf32>
      %25 = arith.mulf %24, %20 : vector<2x10xf32>
      %26 = arith.addf %23, %25 : vector<2x10xf32>
      %27 = arith.select %21, %15, %26 : vector<2x10xf32>
      %c0_12 = arith.constant 0 : index
      %c0_13 = arith.constant 0 : index
      %28 = vector.load %arg6[%c0_12, %c0_13] : memref<2x10xf32, #tpu.memory_space<vmem>>, vector<2x10xf32>
      tpu.vector_store %arg6[%c0_12, %c0_13], %27 {strides = array<i32>} : memref<2x10xf32, #tpu.memory_space<vmem>>, vector<2x10xf32>,
    } else {
    }
    return
  }
  func.func @transform_0(%arg0: i32) -> i32 {
    %c0_i32 = arith.constant 0 : i32
    %c0_i32_0 = arith.constant 0 : i32
    return %c0_i32 : i32
  }
  func.func @transform_1(%arg0: i32) -> (i32, i32, i32) {
    %c1_i32 = arith.constant 1 : i32
    %0 = arith.addi %arg0, %c1_i32 : i32
    %c1_i32_0 = arith.constant 1 : i32
    %1 = arith.subi %0, %c1_i32_0 : i32
    %c1_i32_1 = arith.constant 1 : i32
    %c0_i32 = arith.constant 0 : i32
    %2 = arith.cmpi eq, %c1_i32_1, %c0_i32 : i32
    %c1_i32_2 = arith.constant 1 : i32
    %3 = arith.select %2, %c1_i32_2, %c1_i32_1 : i32
    %4 = arith.remsi %1, %3 : i32
    %c0_i32_3 = arith.constant 0 : i32
    %5 = arith.cmpi ne, %4, %c0_i32_3 : i32
    %c0_i32_4 = arith.constant 0 : i32
    %6 = arith.cmpi slt, %4, %c0_i32_4 : i32
    %c0_i32_5 = arith.constant 0 : i32
    %7 = arith.cmpi slt, %3, %c0_i32_5 : i32
    %8 = arith.xori %6, %7 : i1
    %9 = arith.andi %8, %5 : i1
    %10 = arith.addi %4, %3 : i32
    %11 = arith.select %9, %10, %4 : i32
    %c0_i32_6 = arith.constant 0 : i32
    %c0_i32_7 = arith.constant 0 : i32
    %c0_i32_8 = arith.constant 0 : i32
    return %11, %c0_i32_6, %c0_i32_7 : i32, i32, i32
  }
  func.func @transform_2(%arg0: i32) -> (i32, i32) {
    %c0_i32 = arith.constant 0 : i32
    %c0_i32_0 = arith.constant 0 : i32
    %c0_i32_1 = arith.constant 0 : i32
    return %c0_i32, %c0_i32_0 : i32, i32
  }
  func.func @transform_3(%arg0: i32) -> (i32, i32) {
    %c0_i32 = arith.constant 0 : i32
    %c0_i32_0 = arith.constant 0 : i32
    %c0_i32_1 = arith.constant 0 : i32
    return %c0_i32, %c0_i32_0 : i32, i32
  }
  func.func @transform_4(%arg0: i32) -> (i32, i32, i32) {
    %c1_i32 = arith.constant 1 : i32
    %0 = arith.subi %arg0, %c1_i32 : i32
    %c0_i32 = arith.constant 0 : i32
    %1 = arith.maxsi %0, %c0_i32 : i32
    %c0_i32_0 = arith.constant 0 : i32
    %c0_i32_1 = arith.constant 0 : i32
    %c0_i32_2 = arith.constant 0 : i32
    return %1, %c0_i32_0, %c0_i32_1 : i32, i32, i32
  }
  func.func @transform_5(%arg0: i32) -> (i32, i32) {
    %c0_i32 = arith.constant 0 : i32
    %c0_i32_0 = arith.constant 0 : i32
    %c0_i32_1 = arith.constant 0 : i32
    return %c0_i32, %c0_i32_0 : i32, i32
  }
}

</mosaic_0001>

<bundles_post_ra>
// kernel: random_mixup.1
= control target key start
LH: loop header
LB: loop body
LE: loop exit
PB: predicated region body
PF: predicated region fallthrough
CT: control target
= control target key end

     0   :  { %11 = vsyncpa [#allocation5], 0  ;;  %s611_s0 = inlined_call_operand.vmem [shape: f32[2], index: 0, kind: input, shape index: {}]   ;;  %s612_s1 = inlined_call_operand.vmem [shape: f32[2,8,128], index: 1, kind: input, shape index: {}]   ;;  %s613_s2 = inlined_call_operand.vmem [shape: s32[2,1], index: 2, kind: input, shape index: {}]   ;;  %s614_s3 = inlined_call_operand.vmem [shape: s32[2,1], index: 3, kind: input, shape index: {}]   ;;  %s615_s4 = inlined_call_operand.vmem [shape: f32[2,8,128], index: 4, kind: output, shape index: {0}]   ;;  %s616_s5 = inlined_call_operand.hbm [shape: f32[2,10], index: 5, kind: output, shape index: {1}]  }
   0x1   :  { %12 = vsyncpa [#allocation4], 0  ;;  %s526_s18 = smov 0  }
   0x2 LB: > { %s532_s19 = sadd.s32 4294967295, %s490_s18   ;;  %p388_p0 = scmp.ge.s32.totalorder %s490_s18, 1  ;;  %s490_s18 = sphi %s526_s18, %s18_s18  }
   0x3   : > { %p160_p1 = scmp.lt.s32.totalorder %s490_s18, 3  ;;  %s173_s22 = sshll.u32 %s611_s0, 4  ;;  %s174_s22 = int_to_ptr.vmem [resolvable:$true] %s173_s22 }
   0x4   : > { %p418_p3 = scmp.eq.s32.totalorder %s532_s19, 0  ;;  %s435_s24 = scalar_lea.vmem %s174_s22, 16 }
   0x5   : > { %p539_p2 = pnand %p388_p0, %p160_p1  ;;  %p436_p6 = scmp.ne.s32.totalorder %s174_s22, %s435_s24 }
   0x6   : > { %p443_p10 = scmp.lt.s32.totalorder %s174_s22, %s174_s22  ;;  %p444_p11 = scmp.lt.s32.totalorder %s435_s24, %s435_s24 }
   0x7   : > { %p414_p4 = pneg %p539_p2 }
   0x8   : > { %p445_p12 = por %p444_p11, %p443_p10 }
   0x9   : > { %p415_p5 = pnand %p418_p3, %p414_p4 }
   0xb   : > { %p437_p7 = pneg %p415_p5 }
   0xd   : > { %p438_p8 = pnand %p437_p7, %p436_p6 }
   0xf   : > { %p439_p9 = pneg %p438_p8 }
  0x11   : > { %p446_p13 = pnand %p445_p12, %p439_p9 }
  0x13   : > { %449 = shalt.err (!%p446_p13)
}
  0x14   : > { %s492_s25 = smov [#allocation3]   ;;  %195 = sbr.rel (%p539_p2) target bundleno = 215 (0xd7), region = 36 }
  0x15   : > { %417 = dma.vmem_to_smem (!%p415_p5), %s174_s22, 16, %s492_s25, [#allocation5]  }
  0x1b   : > { %481 = dma.done.wait (%p418_p3), [#allocation5], 16  }
  0x1c   : > { %483 = vsyncadd (%p418_p3), [#allocation5], 4294967280 }
  0x1d   : > { %201 = sfence }
  0x1e   : > { %s392_s26 = sadd.s32 4294967295, %s532_s19  ;;  %s555_s27 = sld [smem:[#allocation3]] }
  0x1f   : > { %p223_p0 = scmp.gt.s32.totalorder %s392_s26, 0  ;;  %s557_s28 = sld [smem:[#allocation3 + $0x1]] }
  0x20   : > { %p396_p2 = scmp.le.s32.totalorder %s532_s19, 0 }
  0x21   : > { %s619_s26 = smov (!%p223_p0, %s392_s26), 0  ;;  %v240_v0 = vld [vmem:[%s612_s1] sm:$0xff] (!%p396_p2)  ;;  %v241_v4 = vld [vmem:[%s612_s1 + $0x8] sm:$0xff] (!%p396_p2) }
  0x22   : > { %s393_s29 = sshll.u32 %s619_s26, 1  ;;  %239 = sbr.rel (%p396_p2) target bundleno = 47 (0x2f), region = 44  ;;  %v242_v1 = vld [vmem:[#allocation2] sm:$0xff] (!%p396_p2) }
  0x23   : > { %p226_p1 = scmp.lt.s32.totalorder %s393_s29, 1 }
  0x24   : > { %v244_v2 = vstv (!%p396_p2), %s555_s27 }
  0x25   : > { %s621_s29 = smov (!%p226_p1, %s393_s29), 1  ;;  %p243_p3 = scmp.eq.f32.partialorder (!%p396_p2), %s557_s28, 0.0  ;;  %v246_v3 = vstv (!%p396_p2), %s557_s28  ;;  %v245_v5 = vmul.f32 (!%p396_p2), %v244_v2, %v240_v0  ;;  %v254_v8 = vmul.f32 (!%p396_p2), %v244_v2, %v241_v4 }
  0x26   : > { %s394_s30 = sshll.u32 %s621_s29, 3  ;;  %v247_v6 = vmul.f32 (!%p396_p2), %v246_v3, %v242_v1  ;;  %v255_v7 = vmul.f32 (!%p396_p2), %v246_v3, %v240_v0 }
  0x27   : > { %s229_s8 = scalar_lea.vmem %s615_s4, %s394_s30 }
  0x28   : > { %v248_v9 = vadd.f32 (!%p396_p2), %v247_v6, %v245_v5  ;;  %v256_v10 = vadd.f32 (!%p396_p2), %v255_v7, %v254_v8 }
  0x29   : > { %s249_s13 = scalar_select %p243_p3, 1, 0 }
  0x2b   : > { %v250_v11 = vstv %s249_s13 }
  0x2c   : > { %vm251_vm0 = vcmp.eq.s32.totalorder %v250_v11, 1 }
  0x2d   : > { %v252_v12 = vsel %vm251_vm0, %v240_v0, %v248_v9  ;;  %v257_v13 = vsel %vm251_vm0, %v241_v4, %v256_v10 }
  0x2e   : > { %253 = vst [vmem:[%s229_s8] sm:$0xff] %v252_v12  ;;  %397 = vst [vmem:[%s229_s8 + $0x8] sm:$0xff] %v257_v13 }
  0x2f PF: > { %v398_v14 = vld [vmem:[%s612_s1 + $0x8] sm:$0xff]  ;;  %p399_p4 = scmp.ne.s32.totalorder %s532_s19, 1 }
  0x30   : > { %262 = vst [vmem:[#allocation2] sm:$0xff] %v398_v14  ;;  %v269_v15 = vld [vmem:[%s613_s2] sm:$0x3] (!%p399_p4)  ;;  %v493_v16 = vmov (!%p399_p4), 0   ;;  %v267_v18 = vlaneseq (!%p399_p4)  ;;  %p283_p5 = scmp.eq.f32.partialorder (!%p399_p4), %s557_s28, 0.0  ;;  %v284_v21 = vstv (!%p399_p4), %s555_s27  ;;  %v494_v22 = vmov (!%p399_p4), 0.0  }
  0x31   : > { %266 = sbr.rel (%p399_p4) target bundleno = 190 (0xbe), region = 48  ;;  %434 = vset.pattern.permute.xlu0 (!%p399_p4), %v493_v16  ;;  %v276_v17 = vld [vmem:[%s614_s3] sm:$0x3] (!%p399_p4)  ;;  %v286_v24 = vstv (!%p399_p4), %s557_s28  ;;  %vm293_vm4 = vcmask (!%p399_p4), 74752  }
  0x32   : > { %271 = vperm.xlu0 (!%p399_p4), %434, %v269_v15   ;;  %v268_v19 = vand.u32 (!%p399_p4), 127, %v267_v18 }
  0x36   : > { %278 = vperm.xlu0 (!%p399_p4), %434, %v276_v17  }
  0x38   : > { %s289_s22 = scalar_select %p283_p5, 1, 0 }
  0x3a   : > { %v290_v26 = vstv %s289_s22 }
  0x3b   : > { %vm291_vm3 = vcmp.eq.s32.totalorder %v290_v26, 1 }
  0xb1   : > { %v272_v20 = vpop.permute.xlu0 %271 }
  0xb2   : > { %vm273_vm1 = vcmp.eq.s32.totalorder %v268_v19, %v272_v20 }
  0xb3   : > { %v400_v23 = vsel %vm273_vm1, 1.0, %v494_v22 }
  0xb4   : > { %v285_v28 = vmul.f32 %v400_v23, %v284_v21 }
  0xb5   : > { %v279_v25 = vpop.permute.xlu0 %278 }
  0xb6   : > { %vm280_vm2 = vcmp.eq.s32.totalorder %v268_v19, %v279_v25 }
  0xb7   : > { %v401_v27 = vsel %vm280_vm2, 1.0, %v494_v22 }
  0xb8   : > { %v287_v29 = vmul.f32 %v401_v27, %v286_v24 }
  0xba   : > { %v288_v30 = vadd.f32 %v287_v29, %v285_v28 }
  0xbc   : > { %v292_v31 = vsel %vm291_vm3, %v400_v23, %v288_v30 }
  0xbd   : > { %294 = vst.msk [vmem:[#allocation6] sm:$0x3] %vm293_vm4, %v292_v31 }
  0xbe PF: > { %p420_p6 = scmp.eq.s32.totalorder %s532_s19, 1  ;;  %s495_s23 = smov [#allocation6]  }
  0xbf   : > { %s317_s24 = sshll.u32 %s495_s23, 4  ;;  %s318_s24 = int_to_ptr.vmem [resolvable:$true] %s317_s24 }
  0xc0   : > { %s450_s25 = scalar_lea.vmem %s318_s24, 32  ;;  %p457_p10 = scmp.lt.s32.totalorder %s318_s24, %s318_s24 }
  0xc1   : > { %p451_p7 = scmp.ne.s32.totalorder %s318_s24, %s450_s25  ;;  %p458_p11 = scmp.lt.s32.totalorder %s450_s25, %s450_s25 }
  0xc3   : > { %p452_p8 = pnand %p451_p7, %p420_p6  ;;  %p459_p12 = por %p458_p11, %p457_p10 }
  0xc5   : > { %p453_p9 = pneg %p452_p8 }
  0xc7   : > { %p460_p13 = pnand %p459_p12, %p453_p9 }
  0xc9   : > { %463 = shalt.err (!%p460_p13)
}
  0xca   : > { %s464_s28 = scalar_lea.hbm %s616_s5, 32 }
  0xcb   : > { %p465_p0 = scmp.ne.s32.totalorder %s616_s5, %s464_s28  ;;  %p470_p3 = scmp.lt.u32.totalorder %s464_s28, %s616_s5 }
  0xcd   : > { %p466_p1 = pnand %p465_p0, %p420_p6 }
  0xcf   : > { %p467_p2 = pneg %p466_p1 }
  0xd1   : > { %p472_p4 = pnand %p470_p3, %p467_p2 }
  0xd3   : > { %475 = shalt.err (!%p472_p4)
}
  0xd4   : > { %411 = dma.vmem_to_hbm [thread:$0]  (%p420_p6), %s318_s24, 32, %s616_s5, [#allocation4]  }
  0xd5   : > { %485 = dma.done.wait (%p420_p6), [#allocation4], 32  }
  0xd6   : > { %487 = vsyncadd (%p420_p6), [#allocation4], 4294967264 }
  0xd7 PF: > { %s18_s18 = sadd.s32 1, %s490_s18  }
  0xd8   : > { %p15_p5 = scmp.ge.s32.totalorder %s18_s18, 4  }
  0xda   :  { %17 = sbr.rel (!%p15_p5) target bundleno = 2 (0x2), region = 87 }
  0xe1   :  { %341 = vsyncpa [#allocation4], 1 }
  0xe2   :  { %343 = vsyncpa [#allocation4 + $0x1], 1 }
  0xe3   :  { %344 = vsyncpa [#allocation5], 1 }
  0xe4   :  { %346 = vsyncpa [#allocation5 + $0x1], 1 }

</bundles_post_ra>
